<compile_context>
chip_gen: v7x
topology: tpu7x:2x2x1
jax: 0.10.0
libtpu: 0.0.40
codegen_flags: <defaults>
</compile_context>

<pallas_src>
import functools

import jax
import jax.numpy as jnp
from jax.experimental import pallas as pl
from jax.experimental.pallas import tpu as pltpu

PAD = 128            # lane-dense width for all intermediate / output feature dims
MAX_BATCH_TILE = 512 # rows per grid step for large batches


# ----------------------------- Pallas kernel --------------------------------
def _bc_kernel(obs_ref, qpos_ref,
               w0_ref, w03_ref, w3q_ref, w4_ref, w7_ref, bias_ref,
               out_ref):
    """Fused eval-mode BCNetwork forward for one batch tile.

    Weights already have the BatchNorm affines folded in and are zero-padded to
    128 output lanes; bias_ref rows are (b0', b3', b4', b7), each padded to 128.
    """
    f32 = jnp.float32
    obs = obs_ref[...]
    qpos = qpos_ref[...]
    bias = bias_ref[...]

    # l0 (+bn0 folded) -> relu
    h0 = jnp.maximum(
        jnp.dot(obs, w0_ref[...], preferred_element_type=f32) + bias[0:1, :], 0.0)

    # vis_out fused into l3 over cat([v, qpos]) (+bn3 folded) -> relu
    h3 = jnp.maximum(
        jnp.dot(h0, w03_ref[...], preferred_element_type=f32)
        + jnp.dot(qpos, w3q_ref[...], preferred_element_type=f32)
        + bias[1:2, :], 0.0)

    # l4 (+bn4 folded) -> relu
    h4 = jnp.maximum(
        jnp.dot(h3, w4_ref[...], preferred_element_type=f32) + bias[2:3, :], 0.0)

    # l7 (pn_drop identity in eval)
    out_ref[...] = (jnp.dot(h4, w7_ref[...], preferred_element_type=f32)
                    + bias[3:4, :]).astype(out_ref.dtype)


# ------------------------------- Wrapper -------------------------------------
def _fold_bn(gamma, beta, mean, var, eps=1e-5):   # PyTorch BatchNorm1d default eps
    scale = gamma / jnp.sqrt(var + eps)
    shift = beta - mean * scale
    return scale[None, :], shift[None, :]


def _round_up(x, m):
    return ((x + m - 1) // m) * m


def _pad2(a, rows, cols):
    return jnp.pad(a, ((0, rows - a.shape[0]), (0, cols - a.shape[1])))


def _fold_and_pad(params, use_real):
    """Fold BN affines into weights, fuse vis_out into l3, pad dims to 128 lanes."""
    s0, t0 = params["real_bn0"] if use_real else params["sim_bn0"]
    s3, t3 = params["real_bn3"] if use_real else params["sim_bn3"]
    s4, t4 = params["real_bn4"] if use_real else params["sim_bn4"]

    # l0 + bn0
    w0f = params["w0"] * s0
    b0f = params["b0"] * s0 + t0

    # vis_out fused into l3 (Dropout identity in eval), then bn3
    w03 = params["wv"] @ params["w3v"]
    b03 = params["bv"] @ params["w3v"] + params["b3"]
    w03f = w03 * s3
    w3qf = params["w3q"] * s3
    b3f = b03 * s3 + t3

    # l4 + bn4
    w4f = params["w4"] * s4
    b4f = params["b4"] * s4 + t4

    obs_dim = params["w0"].shape[0]
    qpos_dim = params["w3q"].shape[0]

    # Zero-pad output (lane) dims to 128 so all matmul results / stores are
    # lane-dense; zero columns + zero biases stay zero through the ReLUs.
    w0p = _pad2(w0f, obs_dim, PAD)
    w03p = _pad2(w03f, PAD, PAD)
    w3qp = _pad2(w3qf, qpos_dim, PAD)
    w4p = _pad2(w4f, PAD, PAD)
    w7p = _pad2(params["w7"], PAD, PAD)
    biases = jnp.concatenate(
        [_pad2(b0f, 1, PAD), _pad2(b3f, 1, PAD),
         _pad2(b4f, 1, PAD), _pad2(params["b7"], 1, PAD)], axis=0)   # (4, 128)
    return w0p, w03p, w3qp, w4p, w7p, biases


@functools.partial(jax.jit, static_argnames=("use_real",))
def _run_pallas(obs, qpos, params, use_real):
    w0p, w03p, w3qp, w4p, w7p, biases = _fold_and_pad(params, use_real)

    action_dim = params["w7"].shape[1]
    B, obs_dim = obs.shape
    qpos_dim = qpos.shape[1]

    # Batch tiling: single step for tiny batches, pipelined/parallel grid for large.
    tb = min(MAX_BATCH_TILE, _round_up(B, 8))
    bp = _round_up(B, tb)
    if bp != B:
        obs = jnp.pad(obs, ((0, bp - B), (0, 0)))
        qpos = jnp.pad(qpos, ((0, bp - B), (0, 0)))
    grid = (bp // tb,)

    inputs = (obs, qpos, w0p, w03p, w3qp, w4p, w7p, biases)

    def fixed(shape):
        return pl.BlockSpec(shape, lambda i: (0, 0))       # weights: same block each step

    in_specs = [
        pl.BlockSpec((tb, obs_dim), lambda i: (i, 0)),
        pl.BlockSpec((tb, qpos_dim), lambda i: (i, 0)),
        fixed(w0p.shape), fixed(w03p.shape), fixed(w3qp.shape),
        fixed(w4p.shape), fixed(w7p.shape), fixed(biases.shape),
    ]
    out_specs = pl.BlockSpec((tb, PAD), lambda i: (i, 0))

    flops = 2 * bp * (obs_dim * PAD + PAD * PAD + qpos_dim * PAD
                      + PAD * PAD + PAD * PAD)
    bytes_accessed = sum(a.size * 4 for a in inputs) + bp * PAD * 4

    out_padded = pl.pallas_call(
        _bc_kernel,
        out_shape=jax.ShapeDtypeStruct((bp, PAD), jnp.float32),
        grid=grid,
        in_specs=in_specs,
        out_specs=out_specs,
        compiler_params=pltpu.CompilerParams(dimension_semantics=("parallel",)),
        cost_estimate=pl.CostEstimate(
            flops=flops, transcendentals=0, bytes_accessed=bytes_accessed),
    )(*inputs)

    return out_padded[:B, :action_dim]


def bc_network_forward(concatenated_obs, robot_qpos, sim_real_label, params,
                       action_dim=None):
    """Mirrors BCNetwork.forward branch selection (Python-level, like PyTorch)."""
    del action_dim  # derived from params["w7"]
    labels = [bool(x) for x in sim_real_label]
    if not labels:
        raise ValueError("sim_real_label must be non-empty")
    if all(labels):
        use_real = True
    elif not any(labels):
        use_real = False
    else:
        raise NotImplementedError
    return _run_pallas(concatenated_obs, robot_qpos, params, use_real)


def make_params(key, obs_dim, robot_qpos_dim, action_dim):
    """Deterministic synthetic parameters with the same shapes as the PyTorch module."""
    d0 = obs_dim // 2            # l0 out
    dv = obs_dim // 4            # vis_out out
    chin = dv + robot_qpos_dim
    d3 = chin // 2
    d4 = chin // 4

    def lin(k, din, dout):
        kw, kb = jax.random.split(k)
        w = jax.random.normal(kw, (din, dout), jnp.float32) * 0.05   # stored as [in, out]
        b = jax.random.normal(kb, (1, dout), jnp.float32) * 0.05
        return w, b

    def bn(k, d):
        kg, kb, km, kv = jax.random.split(k, 4)
        gamma = 1.0 + 0.1 * jax.random.normal(kg, (d,), jnp.float32)
        beta = 0.1 * jax.random.normal(kb, (d,), jnp.float32)
        mean = 0.1 * jax.random.normal(km, (d,), jnp.float32)
        var = jnp.abs(1.0 + 0.1 * jax.random.normal(kv, (d,), jnp.float32))
        return _fold_bn(gamma, beta, mean, var)

    keys = jax.random.split(key, 12)
    p = {}
    p["w0"], p["b0"] = lin(keys[0], obs_dim, d0)
    p["real_bn0"] = bn(keys[1], d0)
    p["sim_bn0"] = bn(keys[2], d0)
    p["wv"], p["bv"] = lin(keys[3], d0, dv)
    w3, p["b3"] = lin(keys[4], chin, d3)
    p["w3v"], p["w3q"] = w3[:dv, :], w3[dv:, :]        # split cat([vis, qpos]) weight
    p["real_bn3"] = bn(keys[5], d3)
    p["sim_bn3"] = bn(keys[6], d3)
    p["w4"], p["b4"] = lin(keys[7], d3, d4)
    p["real_bn4"] = bn(keys[8], d4)
    p["sim_bn4"] = bn(keys[9], d4)
    p["w7"], p["b7"] = lin(keys[10], d4, action_dim)
    return p


# ------------------------- Pure-JAX reference (unfused) -----------------------
def bc_network_ref(obs, qpos, params, use_real):
    bn0 = params["real_bn0"] if use_real else params["sim_bn0"]
    bn3 = params["real_bn3"] if use_real else params["sim_bn3"]
    bn4 = params["real_bn4"] if use_real else params["sim_bn4"]
    h0 = jnp.maximum((obs @ params["w0"] + params["b0"]) * bn0[0] + bn0[1], 0.0)
    v = h0 @ params["wv"] + params["bv"]
    x1 = jnp.concatenate([v, qpos], axis=1)
    w3 = jnp.concatenate([params["w3v"], params["w3q"]], axis=0)
    h3 = jnp.maximum((x1 @ w3 + params["b3"]) * bn3[0] + bn3[1], 0.0)
    h4 = jnp.maximum((h3 @ params["w4"] + params["b4"]) * bn4[0] + bn4[1], 0.0)
    return h4 @ params["w7"] + params["b7"]


# --------------------------------- Main ---------------------------------------
if __name__ == "__main__":
    OBS_DIM = 64
    ROBOT_QPOS_DIM = 8
    ACTION_DIM = 4
    BATCH = 8

    key = jax.random.PRNGKey(0)
    k_obs, k_qpos, k_params = jax.random.split(key, 3)

    concatenated_obs = jax.random.normal(k_obs, (BATCH, OBS_DIM), jnp.float32)
    robot_qpos = jax.random.normal(k_qpos, (BATCH, ROBOT_QPOS_DIM), jnp.float32)
    sim_real_label = [True] * BATCH        # "real" branch

    params = make_params(k_params, OBS_DIM, ROBOT_QPOS_DIM, ACTION_DIM)

    action = bc_network_forward(concatenated_obs, robot_qpos, sim_real_label,
                                params, ACTION_DIM)
    action = jax.block_until_ready(action)

    # correctness check against unfused pure-JAX reference
    ref = bc_network_ref(concatenated_obs, robot_qpos, params, use_real=True)
    assert action.shape == (BATCH, ACTION_DIM)
    assert jnp.max(jnp.abs(action - ref)) < 1e-4, "mismatch vs reference"

    # also exercise the "sim" branch
    sim_action = bc_network_forward(concatenated_obs, robot_qpos, [False] * BATCH,
                                    params, ACTION_DIM)
    jax.block_until_ready(sim_action)
    sim_ref = bc_network_ref(concatenated_obs, robot_qpos, params, use_real=False)
    assert jnp.max(jnp.abs(sim_action - sim_ref)) < 1e-4, "mismatch vs reference (sim)"

    print("KERNEL_OK")
</pallas_src>

<mosaic_0001>
module attributes {stable_mosaic.version = 11 : i64} {
  func.func @_bc_kernel(%arg0: i32, %arg1: memref<8x64xf32, #tpu.memory_space<vmem>>, %arg2: memref<8x8xf32, #tpu.memory_space<vmem>>, %arg3: memref<64x128xf32, #tpu.memory_space<vmem>>, %arg4: memref<128x128xf32, #tpu.memory_space<vmem>>, %arg5: memref<8x128xf32, #tpu.memory_space<vmem>>, %arg6: memref<128x128xf32, #tpu.memory_space<vmem>>, %arg7: memref<128x128xf32, #tpu.memory_space<vmem>>, %arg8: memref<4x128xf32, #tpu.memory_space<vmem>>, %arg9: memref<8x128xf32, #tpu.memory_space<vmem>>) attributes {dimension_semantics = [#tpu.dimension_semantics<parallel>], iteration_bounds = array<i64: 1>, scalar_prefetch = 0 : i64, scratch_operands = 0 : i64, tpu.core_type = #tpu.core_type<tc>, window_params = [{transform_indices = @transform_0, window_bounds = array<i64: 8, 64>}, {transform_indices = @transform_1, window_bounds = array<i64: 8, 8>}, {pipeline_mode = #tpu.pipeline_mode<synchronous>, transform_indices = @transform_2, window_bounds = array<i64: 64, 128>}, {pipeline_mode = #tpu.pipeline_mode<synchronous>, transform_indices = @transform_3, window_bounds = array<i64: 128, 128>}, {pipeline_mode = #tpu.pipeline_mode<synchronous>, transform_indices = @transform_4, window_bounds = array<i64: 8, 128>}, {pipeline_mode = #tpu.pipeline_mode<synchronous>, transform_indices = @transform_5, window_bounds = array<i64: 128, 128>}, {pipeline_mode = #tpu.pipeline_mode<synchronous>, transform_indices = @transform_6, window_bounds = array<i64: 128, 128>}, {pipeline_mode = #tpu.pipeline_mode<synchronous>, transform_indices = @transform_7, window_bounds = array<i64: 4, 128>}, {transform_indices = @transform_8, window_bounds = array<i64: 8, 128>}]} {
    %c0 = arith.constant 0 : index
    %c0_0 = arith.constant 0 : index
    %0 = vector.load %arg1[%c0, %c0_0] : memref<8x64xf32, #tpu.memory_space<vmem>>, vector<8x64xf32>
    %c0_1 = arith.constant 0 : index
    %c0_2 = arith.constant 0 : index
    %1 = vector.load %arg2[%c0_1, %c0_2] : memref<8x8xf32, #tpu.memory_space<vmem>>, vector<8x8xf32>
    %c0_3 = arith.constant 0 : index
    %c0_4 = arith.constant 0 : index
    %2 = vector.load %arg8[%c0_3, %c0_4] : memref<4x128xf32, #tpu.memory_space<vmem>>, vector<4x128xf32>
    %c0_5 = arith.constant 0 : index
    %c0_6 = arith.constant 0 : index
    %3 = vector.load %arg3[%c0_5, %c0_6] : memref<64x128xf32, #tpu.memory_space<vmem>>, vector<64x128xf32>
    %cst = arith.constant dense<0.000000e+00> : vector<8x128xf32>
    %4 = tpu.matmul %0, %3, %cst {dimension_numbers = #tpu.dot_dimension_numbers<[1], [0], [0], [1], [0, 0, 1, 1], [], []>} : vector<8x64xf32>, vector<64x128xf32>, vector<8x128xf32> -> vector<8x128xf32>
    %5 = vector.extract_strided_slice %2 {offsets = [0, 0], sizes = [1, 128], strides = [1, 1]} : vector<4x128xf32> to vector<1x128xf32>
    %6 = vector.broadcast %5 : vector<1x128xf32> to vector<8x128xf32>
    %7 = arith.addf %4, %6 : vector<8x128xf32>
    %cst_7 = arith.constant 0.000000e+00 : f32
    %8 = vector.broadcast %cst_7 : f32 to vector<8x128xf32>
    %9 = arith.maximumf %7, %8 : vector<8x128xf32>
    %c0_8 = arith.constant 0 : index
    %c0_9 = arith.constant 0 : index
    %10 = vector.load %arg4[%c0_8, %c0_9] : memref<128x128xf32, #tpu.memory_space<vmem>>, vector<128x128xf32>
    %cst_10 = arith.constant dense<0.000000e+00> : vector<8x128xf32>
    %11 = tpu.matmul %9, %10, %cst_10 {dimension_numbers = #tpu.dot_dimension_numbers<[1], [0], [0], [1], [0, 0, 1, 1], [], []>} : vector<8x128xf32>, vector<128x128xf32>, vector<8x128xf32> -> vector<8x128xf32>
    %c0_11 = arith.constant 0 : index
    %c0_12 = arith.constant 0 : index
    %12 = vector.load %arg5[%c0_11, %c0_12] : memref<8x128xf32, #tpu.memory_space<vmem>>, vector<8x128xf32>
    %cst_13 = arith.constant dense<0.000000e+00> : vector<8x128xf32>
    %13 = tpu.matmul %1, %12, %cst_13 {dimension_numbers = #tpu.dot_dimension_numbers<[1], [0], [0], [1], [0, 0, 1, 1], [], []>} : vector<8x8xf32>, vector<8x128xf32>, vector<8x128xf32> -> vector<8x128xf32>
    %14 = arith.addf %11, %13 : vector<8x128xf32>
    %15 = vector.extract_strided_slice %2 {offsets = [1, 0], sizes = [1, 128], strides = [1, 1]} : vector<4x128xf32> to vector<1x128xf32>
    %16 = vector.broadcast %15 : vector<1x128xf32> to vector<8x128xf32>
    %17 = arith.addf %14, %16 : vector<8x128xf32>
    %cst_14 = arith.constant 0.000000e+00 : f32
    %18 = vector.broadcast %cst_14 : f32 to vector<8x128xf32>
    %19 = arith.maximumf %17, %18 : vector<8x128xf32>
    %c0_15 = arith.constant 0 : index
    %c0_16 = arith.constant 0 : index
    %20 = vector.load %arg6[%c0_15, %c0_16] : memref<128x128xf32, #tpu.memory_space<vmem>>, vector<128x128xf32>
    %cst_17 = arith.constant dense<0.000000e+00> : vector<8x128xf32>
    %21 = tpu.matmul %19, %20, %cst_17 {dimension_numbers = #tpu.dot_dimension_numbers<[1], [0], [0], [1], [0, 0, 1, 1], [], []>} : vector<8x128xf32>, vector<128x128xf32>, vector<8x128xf32> -> vector<8x128xf32>
    %22 = vector.extract_strided_slice %2 {offsets = [2, 0], sizes = [1, 128], strides = [1, 1]} : vector<4x128xf32> to vector<1x128xf32>
    %23 = vector.broadcast %22 : vector<1x128xf32> to vector<8x128xf32>
    %24 = arith.addf %21, %23 : vector<8x128xf32>
    %cst_18 = arith.constant 0.000000e+00 : f32
    %25 = vector.broadcast %cst_18 : f32 to vector<8x128xf32>
    %26 = arith.maximumf %24, %25 : vector<8x128xf32>
    %c0_19 = arith.constant 0 : index
    %c0_20 = arith.constant 0 : index
    %27 = vector.load %arg7[%c0_19, %c0_20] : memref<128x128xf32, #tpu.memory_space<vmem>>, vector<128x128xf32>
    %cst_21 = arith.constant dense<0.000000e+00> : vector<8x128xf32>
    %28 = tpu.matmul %26, %27, %cst_21 {dimension_numbers = #tpu.dot_dimension_numbers<[1], [0], [0], [1], [0, 0, 1, 1], [], []>} : vector<8x128xf32>, vector<128x128xf32>, vector<8x128xf32> -> vector<8x128xf32>
    %29 = vector.extract_strided_slice %2 {offsets = [3, 0], sizes = [1, 128], strides = [1, 1]} : vector<4x128xf32> to vector<1x128xf32>
    %30 = vector.broadcast %29 : vector<1x128xf32> to vector<8x128xf32>
    %31 = arith.addf %28, %30 : vector<8x128xf32>
    %c0_22 = arith.constant 0 : index
    %c0_23 = arith.constant 0 : index
    %32 = vector.load %arg9[%c0_22, %c0_23] : memref<8x128xf32, #tpu.memory_space<vmem>>, vector<8x128xf32>
    tpu.vector_store %arg9[%c0_22, %c0_23], %31 {strides = array<i32>} : memref<8x128xf32, #tpu.memory_space<vmem>>, vector<8x128xf32>,
    return
  }
  func.func @transform_0(%arg0: i32) -> (i32, i32) {
    %c0_i32 = arith.constant 0 : i32
    %c0_i32_0 = arith.constant 0 : i32
    return %arg0, %c0_i32 : i32, i32
  }
  func.func @transform_1(%arg0: i32) -> (i32, i32) {
    %c0_i32 = arith.constant 0 : i32
    %c0_i32_0 = arith.constant 0 : i32
    return %arg0, %c0_i32 : i32, i32
  }
  func.func @transform_2(%arg0: i32) -> (i32, i32) {
    %c0_i32 = arith.constant 0 : i32
    %c0_i32_0 = arith.constant 0 : i32
    %c0_i32_1 = arith.constant 0 : i32
    return %c0_i32, %c0_i32_0 : i32, i32
  }
  func.func @transform_3(%arg0: i32) -> (i32, i32) {
    %c0_i32 = arith.constant 0 : i32
    %c0_i32_0 = arith.constant 0 : i32
    %c0_i32_1 = arith.constant 0 : i32
    return %c0_i32, %c0_i32_0 : i32, i32
  }
  func.func @transform_4(%arg0: i32) -> (i32, i32) {
    %c0_i32 = arith.constant 0 : i32
    %c0_i32_0 = arith.constant 0 : i32
    %c0_i32_1 = arith.constant 0 : i32
    return %c0_i32, %c0_i32_0 : i32, i32
  }
  func.func @transform_5(%arg0: i32) -> (i32, i32) {
    %c0_i32 = arith.constant 0 : i32
    %c0_i32_0 = arith.constant 0 : i32
    %c0_i32_1 = arith.constant 0 : i32
    return %c0_i32, %c0_i32_0 : i32, i32
  }
  func.func @transform_6(%arg0: i32) -> (i32, i32) {
    %c0_i32 = arith.constant 0 : i32
    %c0_i32_0 = arith.constant 0 : i32
    %c0_i32_1 = arith.constant 0 : i32
    return %c0_i32, %c0_i32_0 : i32, i32
  }
  func.func @transform_7(%arg0: i32) -> (i32, i32) {
    %c0_i32 = arith.constant 0 : i32
    %c0_i32_0 = arith.constant 0 : i32
    %c0_i32_1 = arith.constant 0 : i32
    return %c0_i32, %c0_i32_0 : i32, i32
  }
  func.func @transform_8(%arg0: i32) -> (i32, i32) {
    %c0_i32 = arith.constant 0 : i32
    %c0_i32_0 = arith.constant 0 : i32
    return %arg0, %c0_i32 : i32, i32
  }
}

</mosaic_0001>

<bundles_post_ra>
// kernel: _run_pallas.1
= control target key start
LH: loop header
LB: loop body
LE: loop exit
PB: predicated region body
PF: predicated region fallthrough
CT: control target
= control target key end

     0   :  { %v752_v0 = vmov 0.0|0.0   ;;  %vm753_vm0 = vmmov 0   ;;  %v754_v4 = vmov 0.0   ;;  %vm44_vm1 = vcmask 523264   ;;  %s1034_s2 = inlined_call_operand.vmem [shape: f32[64,128], index: 2, kind: input, shape index: {}]   ;;  %s1035_s3 = inlined_call_operand.vmem [shape: f32[128,128], index: 3, kind: input, shape index: {}]   ;;  %s1036_s0 = inlined_call_operand.vmem [shape: f32[8,64], index: 0, kind: input, shape index: {}]   ;;  %s1037_s4 = inlined_call_operand.vmem [shape: f32[8,128], index: 4, kind: input, shape index: {}]   ;;  %s1038_s1 = inlined_call_operand.vmem [shape: f32[8,8], index: 1, kind: input, shape index: {}]   ;;  %s1039_s5 = inlined_call_operand.vmem [shape: f32[128,128], index: 5, kind: input, shape index: {}]   ;;  %s1040_s7 = inlined_call_operand.vmem [shape: f32[4,128], index: 7, kind: input, shape index: {}]   ;;  %s1041_s6 = inlined_call_operand.vmem [shape: f32[128,128], index: 6, kind: input, shape index: {}]   ;;  %s1042_s8 = inlined_call_operand.vmem [shape: f32[8,128], index: 8, kind: output, shape index: {}]  }
   0x1   :  { %665 = vmatprep.subr.bf16.mxu0 %v752_v0  ;;  %v32_v1 = vld [vmem:[%s1034_s2] sm:$0xff]  ;;  %v33_v2 = vld [vmem:[%s1034_s2 + $0x8] sm:$0xff]  ;;  %v34_v3 = vld [vmem:[%s1034_s2 + $0x10] sm:$0xff]  ;;  %552 = vmatprep.mubr.msk.f32.mxu0 %vm753_vm0, %v754_v4  ;;  %vm136_vm2 = vcmask 64512   ;;  %v40_v59 = vlaneseq }
   0x2   :  { %v666_v5 = vpack.c.bf16 %v33_v2, %v32_v1  ;;  %v35_v6 = vld [vmem:[%s1034_s2 + $0x18] sm:$0xff]  ;;  %677 = vmatprep.subr.bf16.mxu1 %v752_v0  ;;  %592 = vmatprep.mubr.msk.f32.mxu1 %vm753_vm0, %v754_v4  ;;  %v119_v8 = vld [vmem:[%s1035_s3] sm:$0xff]  ;;  %v120_v9 = vld [vmem:[%s1035_s3 + $0x8] sm:$0xff] }
   0x3   :  { %v669_v7 = vpack.c.bf16 %v35_v6, %v34_v3  ;;  %v121_v10 = vld [vmem:[%s1035_s3 + $0x10] sm:$0xff]  ;;  %v36_v11 = vld [vmem:[%s1034_s2 + $0x20] sm:$0xff]  ;;  %v37_v12 = vld [vmem:[%s1034_s2 + $0x28] sm:$0xff]  ;;  %v678_v13 = vpack.c.bf16 %v120_v9, %v119_v8  ;;  %v946_v60 = vshrl.u32 %v40_v59, 7 }
   0x4   :  { %667 = vmatpush3.bf16.msra.mxu0 %v666_v5  ;;  %v122_v14 = vld [vmem:[%s1035_s3 + $0x18] sm:$0xff]  ;;  %v672_v16 = vpack.c.bf16 %v37_v12, %v36_v11  ;;  %v123_v17 = vld [vmem:[%s1035_s3 + $0x20] sm:$0xff]  ;;  %v124_v18 = vld [vmem:[%s1035_s3 + $0x28] sm:$0xff] }
   0x5   :  { %668 = vmatprep.subr.bf16.mxu0 %v752_v0  ;;  %679 = vmatpush3.bf16.msra.mxu1 %v678_v13  ;;  %v681_v15 = vpack.c.bf16 %v122_v14, %v121_v10  ;;  %v38_v19 = vld [vmem:[%s1034_s2 + $0x30] sm:$0xff]  ;;  %v39_v20 = vld [vmem:[%s1034_s2 + $0x38] sm:$0xff]  ;;  %v684_v21 = vpack.c.bf16 %v124_v18, %v123_v17  ;;  %v29_v26 = vld [vmem:[%s1036_s0] sm:$0xff]  ;;  %v42_v61 = vsub.s32 0, %v946_v60 }
   0x6   :  { %680 = vmatprep.subr.bf16.mxu1 %v752_v0  ;;  %v675_v22 = vpack.c.bf16 %v39_v20, %v38_v19  ;;  %v125_v23 = vld [vmem:[%s1035_s3 + $0x30] sm:$0xff]  ;;  %v126_v24 = vld [vmem:[%s1035_s3 + $0x38] sm:$0xff]  ;;  %v127_v27 = vld [vmem:[%s1035_s3 + $0x40] sm:$0xff] }
   0x7   :  { %v687_v25 = vpack.c.bf16 %v126_v24, %v125_v23  ;;  %v128_v28 = vld [vmem:[%s1035_s3 + $0x48] sm:$0xff]  ;;  %v129_v30 = vld [vmem:[%s1035_s3 + $0x50] sm:$0xff]  ;;  %v130_v31 = vld [vmem:[%s1035_s3 + $0x58] sm:$0xff] }
   0x8   :  { %670 = vmatpush3.bf16.msra.mxu0 %v669_v7  ;;  %v690_v29 = vpack.c.bf16 %v128_v28, %v127_v27  ;;  %v693_v32 = vpack.c.bf16 %v130_v31, %v129_v30  ;;  %v131_v33 = vld [vmem:[%s1035_s3 + $0x60] sm:$0xff]  ;;  %v132_v34 = vld [vmem:[%s1035_s3 + $0x68] sm:$0xff]  ;;  %v133_v36 = vld [vmem:[%s1035_s3 + $0x70] sm:$0xff] }
   0x9   :  { %671 = vmatprep.subr.bf16.mxu0 %v752_v0  ;;  %682 = vmatpush3.bf16.msra.mxu1 %v681_v15  ;;  %v696_v35 = vpack.c.bf16 %v132_v34, %v131_v33  ;;  %v134_v37 = vld [vmem:[%s1035_s3 + $0x78] sm:$0xff]  ;;  %v135_v39 = vld [vmem:[%s1037_s4] sm:$0xff]  ;;  %v287_v42 = vld [vmem:[%s1039_s5 + $0x8] sm:$0xff]  ;;  %v282_v34 = vsub.s32 1, %v946_v60 }
   0xa   :  { %683 = vmatprep.subr.bf16.mxu1 %v752_v0  ;;  %v699_v38 = vpack.c.bf16 %v134_v37, %v133_v36  ;;  %v30_v40 = vld [vmem:[%s1038_s1] sm:$0xff]  ;;  %v288_v43 = vld [vmem:[%s1039_s5 + $0x10] sm:$0xff]  ;;  %v289_v45 = vld [vmem:[%s1039_s5 + $0x18] sm:$0xff] }
   0xb   :  { %v286_v41 = vld [vmem:[%s1039_s5] sm:$0xff]  ;;  %v705_v46 = vpack.c.bf16 %v289_v45, %v288_v43  ;;  %v291_v48 = vld [vmem:[%s1039_s5 + $0x28] sm:$0xff]  ;;  %v292_v50 = vld [vmem:[%s1039_s5 + $0x30] sm:$0xff] }
   0xc   :  { %673 = vmatpush3.bf16.msra.mxu0 %v672_v16  ;;  %v702_v44 = vpack.c.bf16 %v287_v42, %v286_v41  ;;  %v290_v47 = vld [vmem:[%s1039_s5 + $0x20] sm:$0xff]  ;;  %v293_v51 = vld [vmem:[%s1039_s5 + $0x38] sm:$0xff]  ;;  %v295_v54 = vld [vmem:[%s1039_s5 + $0x48] sm:$0xff] }
   0xd   :  { %674 = vmatprep.subr.bf16.mxu0 %v752_v0  ;;  %685 = vmatpush3.bf16.msra.mxu1 %v684_v21  ;;  %v708_v49 = vpack.c.bf16 %v291_v48, %v290_v47  ;;  %v711_v52 = vpack.c.bf16 %v293_v51, %v292_v50  ;;  %v294_v53 = vld [vmem:[%s1039_s5 + $0x40] sm:$0xff]  ;;  %v296_v56 = vld [vmem:[%s1039_s5 + $0x50] sm:$0xff]  ;;  %v297_v57 = vld [vmem:[%s1039_s5 + $0x58] sm:$0xff] }
   0xe   :  { %686 = vmatprep.subr.bf16.mxu1 %v752_v0  ;;  %v714_v55 = vpack.c.bf16 %v295_v54, %v294_v53  ;;  %v717_v58 = vpack.c.bf16 %v297_v57, %v296_v56  ;;  %v952_v62 = vld [vmem:[%s1040_s7] sm:$0xf]  ;;  %v299_v7 = vld [vmem:[%s1039_s5 + $0x68] sm:$0xff]  ;;  %v300_v11 = vld [vmem:[%s1039_s5 + $0x70] sm:$0xff] }
   0xf   :  { %v43_v63 = vrot.slane %v952_v62, %v42_v61  ;;  %v298_v6 = vld [vmem:[%s1039_s5 + $0x60] sm:$0xff]  ;;  %v378_v14 = vld [vmem:[%s1041_s6 + $0x8] sm:$0xff]  ;;  %v379_v15 = vld [vmem:[%s1041_s6 + $0x10] sm:$0xff] }
  0x10   :  { %676 = vmatpush3.bf16.msra.mxu0 %v675_v22  ;;  %v720_v8 = vpack.c.bf16 %v299_v7, %v298_v6  ;;  %v377_v13 = vld [vmem:[%s1041_s6] sm:$0xff]  ;;  %v380_v17 = vld [vmem:[%s1041_s6 + $0x18] sm:$0xff]  ;;  %v382_v20 = vld [vmem:[%s1041_s6 + $0x28] sm:$0xff] }
  0x11   :  { %555 = vmatprep.subr.mxu0 %v754_v4  ;;  %688 = vmatpush3.bf16.msra.mxu1 %v687_v25  ;;  %v726_v16 = vpack.c.bf16 %v378_v14, %v377_v13  ;;  %v729_v18 = vpack.c.bf16 %v380_v17, %v379_v15  ;;  %v381_v19 = vld [vmem:[%s1041_s6 + $0x20] sm:$0xff]  ;;  %v383_v22 = vld [vmem:[%s1041_s6 + $0x30] sm:$0xff]  ;;  %v384_v23 = vld [vmem:[%s1041_s6 + $0x38] sm:$0xff] }
  0x12   :  { %689 = vmatprep.subr.bf16.mxu1 %v752_v0  ;;  %v732_v21 = vpack.c.bf16 %v382_v20, %v381_v19  ;;  %v735_v24 = vpack.c.bf16 %v384_v23, %v383_v22  ;;  %v385_v25 = vld [vmem:[%s1041_s6 + $0x40] sm:$0xff]  ;;  %v387_v28 = vld [vmem:[%s1041_s6 + $0x50] sm:$0xff]  ;;  %v392_v42 = vld [vmem:[%s1041_s6 + $0x78] sm:$0xff] }
  0x13   :  { %553 = vmatmul.mubr.msk.f32.vlgmr.msra.gmra.mrb[0].mxu0 %vm44_vm1, %v29_v26  ;;  %v386_v26 = vld [vmem:[%s1041_s6 + $0x48] sm:$0xff]  ;;  %v389_v31 = vld [vmem:[%s1041_s6 + $0x60] sm:$0xff]  ;;  %v391_v41 = vld [vmem:[%s1041_s6 + $0x70] sm:$0xff] }
  0x14   :  { %557 = vmatprep.mubr.msk.f32.mxu0 %vm753_vm0, %v754_v4  ;;  %556 = vmatpush3.msra.mxu0 %v135_v39  ;;  %v738_v27 = vpack.c.bf16 %v386_v26, %v385_v25  ;;  %v747_v43 = vpack.c.bf16 %v392_v42, %v391_v41 }
  0x15   :  { %691 = vmatpush3.bf16.msra.mxu1 %v690_v29  ;;  %701 = vmatprep.subr.bf16.mxu0 %v752_v0  ;;  %v388_v29 = vld [vmem:[%s1041_s6 + $0x58] sm:$0xff] }
  0x16   :  { %692 = vmatprep.subr.bf16.mxu1 %v752_v0  ;;  %v741_v30 = vpack.c.bf16 %v388_v29, %v387_v28 }
  0x17   :  { %558 = vmatmul.mubr.msk.f32.vlgmr.msra.gmra.mrb[2].mxu0 %vm136_vm2, %v30_v40 }
  0x18   :  { %627 = vmatprep.mubr.msk.f32.mxu0 %vm753_vm0, %v754_v4  ;;  %703 = vmatpush3.bf16.msra.mxu0 %v702_v44 }
  0x19   :  { %694 = vmatpush3.bf16.msra.mxu1 %v693_v32  ;;  %704 = vmatprep.subr.bf16.mxu0 %v752_v0  ;;  %v390_v32 = vld [vmem:[%s1041_s6 + $0x68] sm:$0xff] }
  0x1a   :  { %695 = vmatprep.subr.bf16.mxu1 %v752_v0  ;;  %v744_v33 = vpack.c.bf16 %v390_v32, %v389_v31 }
  0x1c   :  { %706 = vmatpush3.bf16.msra.mxu0 %v705_v46 }
  0x1d   :  { %697 = vmatpush3.bf16.msra.mxu1 %v696_v35  ;;  %707 = vmatprep.subr.bf16.mxu0 %v752_v0  ;;  %v283_v35 = vrot.slane %v952_v62, %v282_v34 }
  0x1e   :  { %698 = vmatprep.subr.bf16.mxu1 %v752_v0 }
  0x20   :  { %709 = vmatpush3.bf16.msra.mxu0 %v708_v49  ;;  %v395_v49 = vsub.s32 3, %v946_v60 }
  0x21   :  { %700 = vmatpush3.bf16.msra.mxu1 %v699_v38  ;;  %710 = vmatprep.subr.bf16.mxu0 %v752_v0 }
  0x22   :  { %725 = vmatprep.subr.bf16.mxu1 %v752_v0  ;;  %v396_v50 = vrot.slane %v952_v62, %v395_v49 }
  0x24   :  { %712 = vmatpush3.bf16.msra.mxu0 %v711_v52 }
  0x25   :  { %713 = vmatprep.subr.bf16.mxu0 %v752_v0 }
  0x28   :  { %715 = vmatpush3.bf16.msra.mxu0 %v714_v55 }
  0x29   :  { %716 = vmatprep.subr.bf16.mxu0 %v752_v0 }
  0x2c   :  { %718 = vmatpush3.bf16.msra.mxu0 %v717_v58 }
  0x2d   :  { %719 = vmatprep.subr.bf16.mxu0 %v752_v0 }
  0x30   :  { %721 = vmatpush3.bf16.msra.mxu0 %v720_v8 }
  0x31   :  { %722 = vmatprep.subr.bf16.mxu0 %v752_v0 }
  0xe6   :  { %v114_v1 = vpop.f32.mrb[0].mxu0 }
  0xe7   :  { %v115_v2 = vadd.f32 %v114_v1, %v43_v63  ;;  %v554_v3 = vpop.f32.mrb[1].mxu0 }
  0xe9   :  { %v118_v5 = vmax.f32 %v115_v2, 0.0 }
  0xea   :  { %v206_v9 = vpop.f32.mrb[2].mxu0 }
  0xeb   :  { %593 = vmatmul.mubr.f32.vlgmr.msra.gmra.mrb[0].mxu1 %v118_v5  ;;  %v559_v10 = vpop.f32.mrb[3].mxu0 }
  0xec   :  { %662 = vmatprep.mubr.msk.f32.mxu1 %vm753_vm0, %v754_v4  ;;  %v301_v4 = vld [vmem:[%s1039_s5 + $0x78] sm:$0xff]  ;;  %727 = vmatpush3.bf16.msra.mxu1 %v726_v16 }
  0xed   :  { %v723_v12 = vpack.c.bf16 %v301_v4, %v300_v11  ;;  %728 = vmatprep.subr.bf16.mxu1 %v752_v0 }
  0xef   :  { %724 = vmatpush3.bf16.msra.mxu0 %v723_v12 }
  0xf0   :  { %730 = vmatpush3.bf16.msra.mxu1 %v729_v18 }
  0xf1   :  { %731 = vmatprep.subr.bf16.mxu1 %v752_v0 }
  0xf4   :  { %733 = vmatpush3.bf16.msra.mxu1 %v732_v21 }
  0xf5   :  { %734 = vmatprep.subr.bf16.mxu1 %v752_v0 }
  0xf8   :  { %736 = vmatpush3.bf16.msra.mxu1 %v735_v24 }
  0xf9   :  { %737 = vmatprep.subr.bf16.mxu1 %v752_v0 }
  0xfc   :  { %739 = vmatpush3.bf16.msra.mxu1 %v738_v27 }
  0xfd   :  { %740 = vmatprep.subr.bf16.mxu1 %v752_v0 }
 0x100   :  { %742 = vmatpush3.bf16.msra.mxu1 %v741_v30 }
 0x101   :  { %743 = vmatprep.subr.bf16.mxu1 %v752_v0 }
 0x104   :  { %745 = vmatpush3.bf16.msra.mxu1 %v744_v33 }
 0x105   :  { %746 = vmatprep.subr.bf16.mxu1 %v752_v0  ;;  %v304_v0 = vsub.s32 2, %v946_v60 }
 0x107   :  { %v305_v44 = vrot.slane %v952_v62, %v304_v0 }
 0x108   :  { %748 = vmatpush3.bf16.msra.mxu1 %v747_v43 }
 0x1be   :  { %v276_v36 = vpop.f32.mrb[0].mxu1 }
 0x1bf   :  { %v277_v37 = vadd.f32 %v276_v36, %v206_v9  ;;  %v594_v38 = vpop.f32.mrb[1].mxu1 }
 0x1c1   :  { %v284_v39 = vadd.f32 %v283_v35, %v277_v37 }
 0x1c3   :  { %v285_v40 = vmax.f32 %v284_v39, 0.0 }
 0x1c5   :  { %628 = vmatmul.mubr.f32.vlgmr.msra.gmra.mrb[4].mxu0 %v285_v40 }
 0x298   :  { %v372_v45 = vpop.f32.mrb[4].mxu0 }
 0x299   :  { %v373_v46 = vadd.f32 %v372_v45, %v305_v44  ;;  %v629_v47 = vpop.f32.mrb[5].mxu0 }
 0x29b   :  { %v376_v48 = vmax.f32 %v373_v46, 0.0 }
 0x29d   :  { %663 = vmatmul.mubr.f32.vlgmr.msra.gmra.mrb[2].mxu1 %v376_v48 }
 0x370   :  { %v463_v51 = vpop.f32.mrb[2].mxu1 }
 0x371   :  { %v464_v52 = vadd.f32 %v463_v51, %v396_v50  ;;  %v664_v53 = vpop.f32.mrb[3].mxu1 }
 0x373   :  { %467 = vst [vmem:[%s1042_s8] sm:$0xff] %v464_v52 }

</bundles_post_ra>
